<compile_context>
chip_gen: v6e
topology: v6e:2x2x1
jax: 0.10.0
libtpu: 0.0.40
codegen_flags: <defaults>
</compile_context>

<pallas_src>
import jax
import jax.numpy as jnp
from jax import lax
from jax.experimental import pallas as pl
from jax.experimental.pallas import tpu as pltpu


def _round_up(n, m):
    return ((n + m - 1) // m) * m


def c_net_kernel(x_ref, w1_ref, b1_ref, w2_ref, b2_ref, o_ref):
    # x_ref : (TB, 4)  batch tile, native layout (no host transpose)
    # w1_ref: (20, 4)  b1_ref: (20, 1)   (VMEM-resident, constant index_map)
    # w2_ref: (1, 20)  b2_ref: (1,) in SMEM
    # o_ref : (1, TB)  lane-dense output tile
    x_blk = x_ref[...]                                           # (TB, 4)

    # h = W1 @ x^T : contract the size-4 feature dim of both operands.
    h = lax.dot_general(
        w1_ref[...], x_blk,
        dimension_numbers=(((1,), (1,)), ((), ())),
        preferred_element_type=jnp.float32)                      # (20, TB)
    h = jnp.maximum(h + b1_ref[...], 0.0)                        # bias + ReLU

    out = jnp.dot(w2_ref[...], h,
                  preferred_element_type=jnp.float32)            # (1, TB)
    o_ref[...] = out + b2_ref[0]                                 # lane-dense store


def c_net_forward(x, w1, b1, w2, b2, *, tb=8192):
    """x: (B, 4) f32.  w1: (20, 4), b1: (20,), w2: (1, 20), b2: (1,) (PyTorch layout).

    Returns (B, 1) f32, matching the module's forward.
    """
    B = x.shape[0]

    # Batch tile: multiple of 128 (lane width).  Aim for >= 2 grid steps when
    # there is enough work (v7x megacore), cap at `tb` to bound VMEM
    # (512*TB bytes per lane-padded (TB,4) buffer, double-buffered).
    TB = min(tb, max(128, _round_up(pl.cdiv(B, 2), 128)))
    n_tiles = pl.cdiv(B, TB)   # ragged tail handled by Pallas block padding

    b1_c = b1.reshape(-1, 1).astype(jnp.float32)                 # (20, 1)
    b2_c = b2.reshape(-1).astype(jnp.float32)                    # (1,) -> SMEM scalar

    flops = 2 * B * (4 * 20 + 20 * 1)                            # ~200 * B
    bytes_accessed = 4 * B * (4 + 1) + 4 * (20 * 4 + 20 + 20 + 1)

    out = pl.pallas_call(
        c_net_kernel,
        out_shape=jax.ShapeDtypeStruct((1, B), jnp.float32),
        grid=(n_tiles,),
        in_specs=[
            # x streams along the batch axis (double-buffered by Pallas).
            pl.BlockSpec((TB, 4), lambda i: (i, 0)),
            # Weights / bias: constant index_map -> stay resident in VMEM.
            pl.BlockSpec((20, 4), lambda i: (0, 0)),
            pl.BlockSpec((20, 1), lambda i: (0, 0)),
            pl.BlockSpec((1, 20), lambda i: (0, 0)),
            # b2 scalar lives in SMEM (no padded VMEM tile for it).
            pl.BlockSpec(memory_space=pltpu.MemorySpace.SMEM),
        ],
        out_specs=pl.BlockSpec((1, TB), lambda i: (0, i)),
        compiler_params=pltpu.CompilerParams(
            dimension_semantics=("parallel",)),
        cost_estimate=pl.CostEstimate(
            flops=flops, transcendentals=0, bytes_accessed=bytes_accessed),
    )(x, w1, b1_c, w2, b2_c)

    # Back to the module's (B, 1) output (same element order as (1, B)).
    return out.reshape(B, 1)


def init_params(key):
    """Params mirroring the module's __init__: weights ~ N(0, 0.1),
    biases ~ U(-1/sqrt(fan_in), +1/sqrt(fan_in))."""
    k1, k2, k3, k4 = jax.random.split(key, 4)
    w1 = 0.1 * jax.random.normal(k1, (20, 4), dtype=jnp.float32)
    b1 = jax.random.uniform(k2, (20,), dtype=jnp.float32,
                            minval=-0.5, maxval=0.5)              # 1/sqrt(4)
    w2 = 0.1 * jax.random.normal(k3, (1, 20), dtype=jnp.float32)
    bound2 = float(1.0 / jnp.sqrt(20.0))
    b2 = jax.random.uniform(k4, (1,), dtype=jnp.float32,
                            minval=-bound2, maxval=bound2)
    return w1, b1, w2, b2


def _reference(x, w1, b1, w2, b2):
    return jnp.maximum(x @ w1.T + b1, 0.0) @ w2.T + b2


if __name__ == "__main__":
    key = jax.random.PRNGKey(0)
    pkey, xkey, xkey2 = jax.random.split(key, 3)
    w1, b1, w2, b2 = init_params(pkey)

    # Small-batch case (single padded block, masked tail columns discarded).
    B = 8
    x = jax.random.normal(xkey, (B, 4), dtype=jnp.float32)
    out = jax.block_until_ready(c_net_forward(x, w1, b1, w2, b2))
    ref = _reference(x, w1, b1, w2, b2)
    assert out.shape == (B, 1)
    assert jnp.allclose(out, ref, atol=1e-5, rtol=1e-5)

    # Multi-tile case exercising the batch grid + ragged tail (2 tiles of 384).
    B2 = 640
    x2 = jax.random.normal(xkey2, (B2, 4), dtype=jnp.float32)
    out2 = jax.block_until_ready(c_net_forward(x2, w1, b1, w2, b2))
    ref2 = _reference(x2, w1, b1, w2, b2)
    assert out2.shape == (B2, 1)
    assert jnp.allclose(out2, ref2, atol=1e-5, rtol=1e-5)

    print("KERNEL_OK")
</pallas_src>

<mosaic_0001>
module attributes {stable_mosaic.version = 11 : i64} {
  func.func @c_net_kernel(%arg0: i32, %arg1: memref<128x4xf32, #tpu.memory_space<vmem>>, %arg2: memref<20x4xf32, #tpu.memory_space<vmem>>, %arg3: memref<20x1xf32, #tpu.memory_space<vmem>>, %arg4: memref<1x20xf32, #tpu.memory_space<vmem>>, %arg5: memref<1xf32, #tpu.memory_space<smem>>, %arg6: memref<1x128xf32, #tpu.memory_space<vmem>>) attributes {dimension_semantics = [#tpu.dimension_semantics<parallel>], iteration_bounds = array<i64: 1>, scalar_prefetch = 0 : i64, scratch_operands = 0 : i64, tpu.core_type = #tpu.core_type<tc>, window_params = [{transform_indices = @transform_0, window_bounds = array<i64: 128, 4>}, {pipeline_mode = #tpu.pipeline_mode<synchronous>, transform_indices = @transform_1, window_bounds = array<i64: 20, 4>}, {pipeline_mode = #tpu.pipeline_mode<synchronous>, transform_indices = @transform_2, window_bounds = array<i64: 20, 1>}, {pipeline_mode = #tpu.pipeline_mode<synchronous>, transform_indices = @transform_3, window_bounds = array<i64: 1, 20>}, {transform_indices = @transform_4, window_bounds = array<i64: 1>}, {transform_indices = @transform_5, window_bounds = array<i64: 1, 128>}]} {
    %c0 = arith.constant 0 : index
    %c0_0 = arith.constant 0 : index
    %0 = vector.load %arg1[%c0, %c0_0] : memref<128x4xf32, #tpu.memory_space<vmem>>, vector<128x4xf32>
    %c0_1 = arith.constant 0 : index
    %c0_2 = arith.constant 0 : index
    %1 = vector.load %arg2[%c0_1, %c0_2] : memref<20x4xf32, #tpu.memory_space<vmem>>, vector<20x4xf32>
    %cst = arith.constant dense<0.000000e+00> : vector<20x128xf32>
    %2 = tpu.matmul %1, %0, %cst {dimension_numbers = #tpu.dot_dimension_numbers<[1], [1], [0], [0], [0, 0, 1, 0], [], []>} : vector<20x4xf32>, vector<128x4xf32>, vector<20x128xf32> -> vector<20x128xf32>
    %c0_3 = arith.constant 0 : index
    %c0_4 = arith.constant 0 : index
    %3 = vector.load %arg3[%c0_3, %c0_4] : memref<20x1xf32, #tpu.memory_space<vmem>>, vector<20x1xf32>
    %4 = vector.broadcast %3 : vector<20x1xf32> to vector<20x128xf32>
    %5 = arith.addf %2, %4 : vector<20x128xf32>
    %cst_5 = arith.constant 0.000000e+00 : f32
    %6 = vector.broadcast %cst_5 : f32 to vector<20x128xf32>
    %7 = arith.maximumf %5, %6 : vector<20x128xf32>
    %c0_6 = arith.constant 0 : index
    %c0_7 = arith.constant 0 : index
    %8 = vector.load %arg4[%c0_6, %c0_7] : memref<1x20xf32, #tpu.memory_space<vmem>>, vector<1x20xf32>
    %cst_8 = arith.constant dense<0.000000e+00> : vector<1x128xf32>
    %9 = tpu.matmul %8, %7, %cst_8 {dimension_numbers = #tpu.dot_dimension_numbers<[1], [0], [0], [1], [0, 0, 1, 1], [], []>} : vector<1x20xf32>, vector<20x128xf32>, vector<1x128xf32> -> vector<1x128xf32>
    %c0_9 = arith.constant 0 : index
    %10 = memref.load %arg5[%c0_9] : memref<1xf32, #tpu.memory_space<smem>>
    %11 = vector.broadcast %10 : f32 to vector<1x128xf32>
    %12 = arith.addf %9, %11 : vector<1x128xf32>
    %c0_10 = arith.constant 0 : index
    %c0_11 = arith.constant 0 : index
    %13 = vector.load %arg6[%c0_10, %c0_11] : memref<1x128xf32, #tpu.memory_space<vmem>>, vector<1x128xf32>
    tpu.vector_store %arg6[%c0_10, %c0_11], %12 {strides = array<i32>} : memref<1x128xf32, #tpu.memory_space<vmem>>, vector<1x128xf32>,
    return
  }
  func.func @transform_0(%arg0: i32) -> (i32, i32) {
    %c0_i32 = arith.constant 0 : i32
    %c0_i32_0 = arith.constant 0 : i32
    return %arg0, %c0_i32 : i32, i32
  }
  func.func @transform_1(%arg0: i32) -> (i32, i32) {
    %c0_i32 = arith.constant 0 : i32
    %c0_i32_0 = arith.constant 0 : i32
    %c0_i32_1 = arith.constant 0 : i32
    return %c0_i32, %c0_i32_0 : i32, i32
  }
  func.func @transform_2(%arg0: i32) -> (i32, i32) {
    %c0_i32 = arith.constant 0 : i32
    %c0_i32_0 = arith.constant 0 : i32
    %c0_i32_1 = arith.constant 0 : i32
    return %c0_i32, %c0_i32_0 : i32, i32
  }
  func.func @transform_3(%arg0: i32) -> (i32, i32) {
    %c0_i32 = arith.constant 0 : i32
    %c0_i32_0 = arith.constant 0 : i32
    %c0_i32_1 = arith.constant 0 : i32
    return %c0_i32, %c0_i32_0 : i32, i32
  }
  func.func @transform_4(%arg0: i32) -> i32 {
    %c0_i32 = arith.constant 0 : i32
    %c0_i32_0 = arith.constant 0 : i32
    return %c0_i32 : i32
  }
  func.func @transform_5(%arg0: i32) -> (i32, i32) {
    %c0_i32 = arith.constant 0 : i32
    %c0_i32_0 = arith.constant 0 : i32
    return %c0_i32, %arg0 : i32, i32
  }
}

</mosaic_0001>

<bundles_post_ra>
// kernel: tpu_custom_call.1
= control target key start
LH: loop header
LB: loop body
LE: loop exit
PB: predicated region body
PF: predicated region fallthrough
CT: control target
= control target key end

     0   :  { %vm59_vm0 = vcmask 31744   ;;  %v418_v1 = vmov 0.0   ;;  %vm419_vm1 = vmmov 0   ;;  %v420_v2 = vmov 0   ;;  %s573_s0 = inlined_call_operand.vmem [shape: f32[8,4], index: 0, kind: input, shape index: {}]   ;;  %s574_s1 = inlined_call_operand.vmem [shape: f32[20,4], index: 1, kind: input, shape index: {}]   ;;  %s575_s2 = inlined_call_operand.vmem [shape: f32[20,1], index: 2, kind: input, shape index: {}]   ;;  %s576_s3 = inlined_call_operand.vmem [shape: f32[1,20], index: 3, kind: input, shape index: {}]   ;;  %s577_s4 = inlined_call_operand.<no memory space> [shape: f32[1], index: 4, kind: input, shape index: {}]   ;;  %s578_s5 = inlined_call_operand.hbm [shape: f32[1,8], index: 5, kind: output, shape index: {}]  }
   0x1   :  { %v37_v0 = vld [vmem:[%s573_s0 + $0x78] sm:$0xff]  ;;  %340 = vmatprep.subr.mxu0 %v418_v1  ;;  %372 = vmatprep.mubr.msk.f32.mxu0 %vm419_vm1, %v418_v1  ;;  %v36_v3 = vld [vmem:[%s573_s0 + $0x70] sm:$0xff]  ;;  %v41_v5 = vld [vmem:[%s575_s2] sm:$0xff] }
   0x2   :  { %341 = vmatpush3.xpose.msk.msra.mxu0 %vm59_vm0, %v37_v0  ;;  %395 = vset.pattern.permute.xlu1 %v420_v2  ;;  %v43_v4 = vld [vmem:[%s575_s2 + $0x10] sm:$0xf]  ;;  %v35_v6 = vld [vmem:[%s573_s0 + $0x68] sm:$0xff] }
   0x3   :  { %342 = vmatprep.subr.mxu0 %v418_v1  ;;  %394 = vset.pattern.permute.xlu0 %v420_v2 }
   0x4   :  { %381 = vmatprep.subr.mxu1 %v418_v1  ;;  %387 = vmatprep.mubr.msk.f32.mxu1 %vm419_vm1, %v418_v1 }
   0x5   :  { %56 = vperm.xlu0 %394, %v43_v4  }
   0x6   :  { %343 = vmatpush3.xpose.msk.msra.mxu0 %vm59_vm0, %v36_v3 }
   0x7   :  { %344 = vmatprep.subr.mxu0 %v418_v1 }
   0x8   :  { %11 = vsyncpa [#allocation4], 0  ;;  %46 = vperm.xlu1 %395, %v41_v5   ;;  %v42_v7 = vld [vmem:[%s575_s2 + $0x8] sm:$0xff]  ;;  %v34_v8 = vld [vmem:[%s573_s0 + $0x60] sm:$0xff]  ;;  %vm207_vm2 = vcmask 1043456   ;;  %vm203_vm3 = vcmask 162816   ;;  %v202_v40 = vstv %s577_s4 }
   0x9   :  { %51 = vperm.xlu0 %394, %v42_v7   ;;  %v33_v9 = vld [vmem:[%s573_s0 + $0x58] sm:$0xff]  ;;  %v32_v10 = vld [vmem:[%s573_s0 + $0x50] sm:$0xff]  ;;  %v31_v11 = vld [vmem:[%s573_s0 + $0x48] sm:$0xff]  ;;  %s421_s12 = smov [#allocation3]  }
   0xa   :  { %345 = vmatpush3.xpose.msk.msra.mxu0 %vm59_vm0, %v35_v6  ;;  %v30_v12 = vld [vmem:[%s573_s0 + $0x40] sm:$0xff]  ;;  %v29_v13 = vld [vmem:[%s573_s0 + $0x38] sm:$0xff]  ;;  %v28_v14 = vld [vmem:[%s573_s0 + $0x30] sm:$0xff]  ;;  %s288_s13 = sshll.u32 %s421_s12, 4  ;;  %s289_s13 = int_to_ptr.vmem [resolvable:$true] %s288_s13 }
   0xb   :  { %346 = vmatprep.subr.mxu0 %v418_v1  ;;  %v27_v15 = vld [vmem:[%s573_s0 + $0x28] sm:$0xff]  ;;  %v26_v16 = vld [vmem:[%s573_s0 + $0x20] sm:$0xff]  ;;  %v25_v17 = vld [vmem:[%s573_s0 + $0x18] sm:$0xff]  ;;  %s396_s14 = scalar_lea.vmem %s289_s13, 16  ;;  %s400_s15 = scalar_lea.vmem %s289_s13, 32 }
   0xc   :  { %v24_v18 = vld [vmem:[%s573_s0 + $0x10] sm:$0xff]  ;;  %v23_v19 = vld [vmem:[%s573_s0 + $0x8] sm:$0xff]  ;;  %v22_v20 = vld [vmem:[%s573_s0] sm:$0xff]  ;;  %p397_p0 = scmp.ne.s32.totalorder %s289_s13, %s396_s14  ;;  %p401_p1 = scmp.lt.s32.totalorder %s289_s13, %s289_s13 }
   0xd   :  { %v38_v21 = vld [vmem:[%s574_s1] sm:$0xff]  ;;  %v39_v22 = vld [vmem:[%s574_s1 + $0x8] sm:$0xff]  ;;  %v40_v23 = vld [vmem:[%s574_s1 + $0x10] sm:$0xf]  ;;  %p402_p2 = scmp.lt.s32.totalorder %s400_s15, %s396_s14 }
   0xe   :  { %347 = vmatpush3.xpose.msk.msra.mxu0 %vm59_vm0, %v34_v8  ;;  %v200_v39 = vld [vmem:[%s576_s3] sm:$0x1] }
   0xf   :  { %348 = vmatprep.subr.mxu0 %v418_v1  ;;  %p403_p3 = por %p402_p2, %p401_p1 }
  0x11   :  { %p404_p4 = pnand %p403_p3, %p397_p0 }
  0x12   :  { %349 = vmatpush3.xpose.msk.msra.mxu0 %vm59_vm0, %v33_v9 }
  0x13   :  { %350 = vmatprep.subr.mxu0 %v418_v1 }
  0x16   :  { %351 = vmatpush3.xpose.msk.msra.mxu0 %vm59_vm0, %v32_v10 }
  0x17   :  { %352 = vmatprep.subr.mxu0 %v418_v1 }
  0x1a   :  { %353 = vmatpush3.xpose.msk.msra.mxu0 %vm59_vm0, %v31_v11 }
  0x1b   :  { %354 = vmatprep.subr.mxu0 %v418_v1 }
  0x1e   :  { %355 = vmatpush3.xpose.msk.msra.mxu0 %vm59_vm0, %v30_v12 }
  0x1f   :  { %356 = vmatprep.subr.mxu0 %v418_v1 }
  0x22   :  { %357 = vmatpush3.xpose.msk.msra.mxu0 %vm59_vm0, %v29_v13 }
  0x23   :  { %358 = vmatprep.subr.mxu0 %v418_v1 }
  0x26   :  { %359 = vmatpush3.xpose.msk.msra.mxu0 %vm59_vm0, %v28_v14 }
  0x27   :  { %360 = vmatprep.subr.mxu0 %v418_v1 }
  0x2a   :  { %361 = vmatpush3.xpose.msk.msra.mxu0 %vm59_vm0, %v27_v15 }
  0x2b   :  { %362 = vmatprep.subr.mxu0 %v418_v1 }
  0x2e   :  { %363 = vmatpush3.xpose.msk.msra.mxu0 %vm59_vm0, %v26_v16 }
  0x2f   :  { %364 = vmatprep.subr.mxu0 %v418_v1 }
  0x32   :  { %365 = vmatpush3.xpose.msk.msra.mxu0 %vm59_vm0, %v25_v17 }
  0x33   :  { %366 = vmatprep.subr.mxu0 %v418_v1 }
  0x36   :  { %367 = vmatpush3.xpose.msk.msra.mxu0 %vm59_vm0, %v24_v18 }
  0x37   :  { %368 = vmatprep.subr.mxu0 %v418_v1 }
  0x3a   :  { %369 = vmatpush3.xpose.msk.msra.mxu0 %vm59_vm0, %v23_v19 }
  0x3b   :  { %370 = vmatprep.subr.mxu0 %v418_v1 }
  0x3e   :  { %371 = vmatpush3.xpose.msk.msra.mxu0 %vm59_vm0, %v22_v20 }
  0x41   :  { %373 = vmatmul.mubr.msk.f32.vlgmr.msra.gmra.mxu0 %vm59_vm0, %v38_v21 }
  0x42   :  { %375 = vmatprep.mubr.msk.f32.mxu0 %vm419_vm1, %v418_v1 }
  0x45   :  { %376 = vmatmul.mubr.msk.f32.gmra.mxu0 %vm59_vm0, %v39_v22 }
  0x46   :  { %378 = vmatprep.mubr.msk.f32.mxu0 %vm419_vm1, %v418_v1 }
  0x49   :  { %379 = vmatmul.mubr.msk.f32.gmra.mxu0 %vm59_vm0, %v40_v23 }
  0x80   :  { %v57_v24 = vpop.permute.xlu0 %56 }
  0x83   :  { %v47_v30 = vpop.permute.xlu1 %46 }
  0x84   :  { %v52_v28 = vpop.permute.xlu0 %51 }
 0x101   :  { %v183_v25 = vpop.f32.mrf.mxu0 }
 0x102   :  { %v184_v35 = vadd.f32 %v183_v25, %v47_v30 }
 0x103   :  { %v374_v26 = vpop.f32.mrf.mxu0 }
 0x104   :  { %v197_v38 = vmax.f32 %v184_v35, 0.0 }
 0x105   :  { %v188_v27 = vpop.f32.mrf.mxu0 }
 0x106   :  { %v189_v32 = vadd.f32 %v188_v27, %v52_v28 }
 0x107   :  { %v377_v29 = vpop.f32.mrf.mxu0 }
 0x108   :  { %v198_v37 = vmax.f32 %v189_v32, 0.0 }
 0x109   :  { %v193_v31 = vpop.f32.mrf.mxu0 }
 0x10a   :  { %v194_v33 = vadd.f32 %v193_v31, %v57_v24 }
 0x10b   :  { %v380_v34 = vpop.f32.mrf.mxu0 }
 0x10c   :  { %v199_v36 = vmax.f32 %v194_v33, 0.0 }
 0x10e   :  { %382 = vmatpush3.msk.msra.mxu1 %vm207_vm2, %v199_v36 }
 0x10f   :  { %383 = vmatprep.subr.mxu1 %v418_v1 }
 0x110   :  { %384 = vmatpush3.msra.mxu1 %v198_v37 }
 0x111   :  { %385 = vmatprep.subr.mxu1 %v418_v1 }
 0x112   :  { %386 = vmatpush3.msra.mxu1 %v197_v38 }
 0x113   :  { %388 = vmatmul.mubr.msk.f32.vlgmr.msra.gmra.mxu1 %vm203_vm3, %v200_v39 }
 0x1d3   :  { %v277_v41 = vpop.f32.mrf.mxu1 }
 0x1d4   :  { %v278_v42 = vadd.f32 %v277_v41, %v202_v40 }
 0x1d5   :  { %v389_v43 = vpop.f32.mrf.mxu1 }
 0x1d6   :  { %281 = vst [vmem:[#allocation3] sm:$0x1] %v278_v42 }
 0x1d7   :  { %407 = shalt.err (!%p404_p4)
}
 0x1d8   :  { %291 = dma.vmem_to_hbm [thread:$0]  %s289_s13, 16, %s578_s5, [#allocation4]  }
 0x1d9   :  { %416 = dma.done.wait [#allocation4], 16  }
 0x1da   :  { %417 = vsyncadd [#allocation4], 4294967280 }
 0x1db   :  { %295 = vsyncpa [#allocation4], 1 }

</bundles_post_ra>
